<compile_context>
chip_gen: v7x
topology: tpu7x:2x2x1
jax: 0.10.0
libtpu: 0.0.40
codegen_flags: <defaults>
</compile_context>

<pallas_src>
import functools

import jax
import jax.numpy as jnp
from jax.experimental import pallas as pl
from jax.experimental.pallas import tpu as pltpu


_PALLAS_MIN_FLOPS = 1 << 24  # below this, kernel overhead dwarfs the matmul


def _round_up(x, m):
    return ((x + m - 1) // m) * m


def _cdiv(a, b):
    return (a + b - 1) // b


# ---------------------------------------------------------------------------
# Generation-aware VMEM sizing
# ---------------------------------------------------------------------------

@functools.lru_cache(maxsize=1)
def _vmem_capacity_bytes():
    try:
        return int(pltpu.get_tpu_info().vmem_capacity_bytes)
    except Exception:
        return 64 * 1024 * 1024  # conservative default (v7x per-TC VMEM)


def _vmem_limit_bytes():
    # ~96 MiB on v5e/v6e (128 MiB physical), ~48 MiB on v7x (64 MiB per TC).
    return min(100 * 1024 * 1024, _vmem_capacity_bytes() * 3 // 4)


def _tile_vmem_budget():
    # Budget for the double-buffered tile footprint (~90 MiB v5e/v6e, ~44 MiB v7x).
    return _vmem_capacity_bytes() * 7 // 10


def _fits_budget(tm, tn, tk, in_bytes, out_bytes, budget):
    footprint = (2 * tm * tk * in_bytes        # x tiles (double-buffered)
                 + 2 * tk * tn * in_bytes      # weight tiles
                 + 2 * tm * tn * out_bytes     # output tiles
                 + tm * tn * 4)                # f32 accumulator (worst case)
    return footprint <= budget


# ---------------------------------------------------------------------------
# Tile selection
# ---------------------------------------------------------------------------

def _choose_nk_tiles(K, N):
    """Pick (tn, tk) and the padded (Kp, Np) for the frozen weight."""
    # N tile: >= 256 wherever possible so the 256-wide MXUs on v6e/v7x are
    # fully fed (pad N up to the next 256/512 multiple); 128 only for tiny N.
    if N <= 128:
        tn = 128
    else:
        tn = 512 if _round_up(N, 256) % 512 == 0 else 256
    Np = _round_up(N, tn)

    # K tile: whole reduction in one tile when it fits (scratch-free kernel),
    # otherwise the largest 128-multiple <= 2048 that divides the padded K.
    Kp = _round_up(K, 128)
    if Kp <= 2048:
        tk = Kp
    else:
        tk = 128
        for cand in (2048, 1536, 1024, 768, 512, 384, 256, 128):
            if Kp % cand == 0:
                tk = cand
                break
    return tn, tk, Kp, Np


def _choose_tm(M, Np, tn):
    """Pick tm (multiple of 16 for bf16 sublane packing), capped at 512."""
    tm = min(512, _round_up(max(M, 1), 16))
    # v7x has two TensorCores: make sure some "parallel" grid axis has >= 2
    # blocks so both cores get work.  The extra grid step (~0.35 us) is
    # negligible on single-TC chips.
    if _cdiv(M, tm) == 1 and Np // tn == 1 and M >= 32:
        tm = _round_up(_cdiv(M, 2), 16)
    return tm


# ---------------------------------------------------------------------------
# Kernels
# ---------------------------------------------------------------------------

def _conv1d_kernel_single_k(x_ref, w_ref, b_ref, o_ref):
    # Whole reduction in one tile: no accumulator scratch, no phases.
    o_ref[...] = (
        jnp.dot(x_ref[...], w_ref[...], preferred_element_type=jnp.float32)
        + b_ref[...]
    ).astype(o_ref.dtype)


def _conv1d_kernel_multi_k_accout(x_ref, w_ref, b_ref, o_ref):
    # f32 output: accumulate directly into the resident output block
    # (output BlockSpec returns the same (i, j) tile for every k).
    @pl.when(pl.program_id(2) == 0)
    def _():
        o_ref[...] = jnp.broadcast_to(b_ref[...], o_ref.shape)

    o_ref[...] = o_ref[...] + jnp.dot(
        x_ref[...], w_ref[...], preferred_element_type=jnp.float32
    )


def _conv1d_kernel_multi_k_scratch(x_ref, w_ref, b_ref, o_ref, acc_ref):
    # Non-f32 output: keep an f32 VMEM accumulator, add bias in finalize.
    @pl.when(pl.program_id(2) == 0)
    def _():
        acc_ref[...] = jnp.zeros_like(acc_ref)

    acc_ref[...] += jnp.dot(
        x_ref[...], w_ref[...], preferred_element_type=jnp.float32
    )

    @pl.when(pl.program_id(2) == pl.num_programs(2) - 1)
    def _():
        o_ref[...] = (acc_ref[...] + b_ref[...]).astype(o_ref.dtype)


# ---------------------------------------------------------------------------
# pallas_call wrapper
# ---------------------------------------------------------------------------

def _pallas_addmm(x2d, w, b, *, tm, tn, tk, out_dtype, vmem_limit):
    Mp, Kp = x2d.shape
    _, Np = w.shape
    grid_m, grid_n, n_k = Mp // tm, Np // tn, Kp // tk

    cost = pl.CostEstimate(
        flops=2 * Mp * Kp * Np,
        transcendentals=0,
        bytes_accessed=(
            x2d.size * x2d.dtype.itemsize
            + grid_m * w.size * w.dtype.itemsize     # weight re-streamed per M block
            + b.size * b.dtype.itemsize
            + Mp * Np * jnp.dtype(out_dtype).itemsize
        ),
    )

    if n_k == 1:
        return pl.pallas_call(
            _conv1d_kernel_single_k,
            out_shape=jax.ShapeDtypeStruct((Mp, Np), out_dtype),
            grid_spec=pltpu.PrefetchScalarGridSpec(
                num_scalar_prefetch=0,
                grid=(grid_m, grid_n),
                in_specs=[
                    pl.BlockSpec((tm, tk), lambda i, j: (i, 0)),   # x tile
                    pl.BlockSpec((tk, tn), lambda i, j: (0, j)),   # weight tile
                    pl.BlockSpec((1, tn), lambda i, j: (0, j)),    # bias tile
                ],
                out_specs=pl.BlockSpec((tm, tn), lambda i, j: (i, j)),
            ),
            compiler_params=pltpu.CompilerParams(
                dimension_semantics=("parallel", "parallel"),
                vmem_limit_bytes=vmem_limit,
            ),
            cost_estimate=cost,
        )(x2d, w, b)

    if jnp.dtype(out_dtype) == jnp.dtype(jnp.float32):
        kernel, scratch = _conv1d_kernel_multi_k_accout, []
    else:
        kernel, scratch = (
            _conv1d_kernel_multi_k_scratch,
            [pltpu.VMEM((tm, tn), jnp.float32)],
        )

    return pl.pallas_call(
        kernel,
        out_shape=jax.ShapeDtypeStruct((Mp, Np), out_dtype),
        grid_spec=pltpu.PrefetchScalarGridSpec(
            num_scalar_prefetch=0,
            grid=(grid_m, grid_n, n_k),
            in_specs=[
                pl.BlockSpec((tm, tk), lambda i, j, k: (i, k)),    # x tile
                pl.BlockSpec((tk, tn), lambda i, j, k: (k, j)),    # weight tile
                pl.BlockSpec((1, tn), lambda i, j, k: (0, j)),     # bias tile
            ],
            out_specs=pl.BlockSpec((tm, tn), lambda i, j, k: (i, j)),
            scratch_shapes=scratch,
        ),
        compiler_params=pltpu.CompilerParams(
            dimension_semantics=("parallel", "parallel", "arbitrary"),
            vmem_limit_bytes=vmem_limit,
        ),
        cost_estimate=cost,
    )(x2d, w, b)


# ---------------------------------------------------------------------------
# Forward pass (jitted) and the frozen module
# ---------------------------------------------------------------------------

@functools.partial(jax.jit, static_argnames=("nf", "tn", "tk", "force_pallas"))
def _frozen_conv1d_forward(x, w_packed, b_packed, *, nf, tn, tk, force_pallas):
    lead = x.shape[:-1]
    nx = x.shape[-1]
    Kp, Np = w_packed.shape
    x2d = x.reshape(-1, nx)
    M = x2d.shape[0]
    out_dtype = x.dtype

    flops = 2 * M * nx * nf
    if (not force_pallas) and flops < _PALLAS_MIN_FLOPS:
        # Tiny problems: Pallas per-call/per-step overhead dwarfs the matmul.
        out2d = (
            jnp.dot(x2d.astype(w_packed.dtype), w_packed[:nx, :nf],
                    preferred_element_type=jnp.float32)
            + b_packed[:, :nf]
        ).astype(out_dtype)
        return out2d.reshape(*lead, nf)

    tm = _choose_tm(M, Np, tn)
    in_b = jnp.dtype(w_packed.dtype).itemsize
    out_b = jnp.dtype(out_dtype).itemsize
    budget = _tile_vmem_budget()
    while tm > 16 and not _fits_budget(tm, tn, tk, in_b, out_b, budget):
        tm = max(16, _round_up(tm // 2, 16))

    Mp = _round_up(M, tm)
    pad_m, pad_k = Mp - M, Kp - nx
    if pad_m or pad_k:
        # Zero padding is inert in the dot; padded rows/cols sliced away below.
        x2d = jnp.pad(x2d, ((0, pad_m), (0, pad_k)))
    x2d = x2d.astype(w_packed.dtype)   # MXU-native compute dtype (bf16)

    out2d = _pallas_addmm(
        x2d, w_packed, b_packed,
        tm=tm, tn=tn, tk=tk, out_dtype=out_dtype,
        vmem_limit=_vmem_limit_bytes(),
    )
    return out2d[:M, :nf].reshape(*lead, nf)


class FrozenConv1D:
    """GPT-2-style Conv1D with a frozen weight: out = x @ weight + bias.

    The frozen weight/bias are padded to the tile grid and cast to the MXU
    compute dtype ONCE at construction (hoisted out of the forward path).
    """

    def __init__(self, weight, bias=None, *, compute_dtype=jnp.bfloat16):
        weight = jnp.asarray(weight)
        self.nx, self.nf = weight.shape
        self.adapter = None  # TODO(synk): adapter is None in the frozen module; LoRA path not implemented.
        self.tn, self.tk, self.Kp, self.Np = _choose_nk_tiles(self.nx, self.nf)

        if bias is None:
            bias = jnp.zeros((self.nf,), jnp.float32)
        bias = jnp.asarray(bias, jnp.float32).reshape(1, self.nf)

        self.w_packed = jnp.pad(
            weight, ((0, self.Kp - self.nx), (0, self.Np - self.nf))
        ).astype(compute_dtype)
        self.b_packed = jnp.pad(bias, ((0, 0), (0, self.Np - self.nf)))

    def __call__(self, x, *, force_pallas=False):
        return _frozen_conv1d_forward(
            x, self.w_packed, self.b_packed,
            nf=self.nf, tn=self.tn, tk=self.tk, force_pallas=force_pallas,
        )

    def __repr__(self):
        return f"{self.__class__.__name__}({self.nx}, {self.nf})"


# ---------------------------------------------------------------------------
# Demo / self-test
# ---------------------------------------------------------------------------

if __name__ == "__main__":
    key = jax.random.PRNGKey(0)
    keys = jax.random.split(key, 9)

    def ref_forward(x, w, b):
        # Reference with the same bf16-input / f32-accumulate numerics as the kernel.
        y = jnp.dot(
            x.reshape(-1, x.shape[-1]).astype(jnp.bfloat16),
            w.astype(jnp.bfloat16),
            preferred_element_type=jnp.float32,
        ) + b
        return y.astype(x.dtype).reshape(*x.shape[:-1], w.shape[1])

    # --- Demo 1: small module-like shape, forced through the Pallas path ---
    # Exercises padding (nf=64 -> lane-dense 128) + the scratch-free single-K kernel.
    batch, seq, nx, nf = 2, 8, 32, 64
    x1 = jax.random.normal(keys[0], (batch, seq, nx), dtype=jnp.float32)
    w1 = jax.random.normal(keys[1], (nx, nf), dtype=jnp.float32) * 0.02
    b1 = jax.random.normal(keys[2], (nf,), dtype=jnp.float32) * 0.02
    layer1 = FrozenConv1D(w1, b1)
    out1 = jax.block_until_ready(layer1(x1, force_pallas=True))
    assert out1.shape == (batch, seq, nf)
    assert jnp.allclose(out1, ref_forward(x1, w1, b1), atol=1e-2, rtol=1e-2)

    # --- Demo 2: mid-size auto-dispatched shape; N padded 320->512 (tn=512),
    #             M split into >=2 parallel blocks for v7x's two TensorCores ---
    b2, s2, nx2, nf2 = 2, 72, 768, 320
    x2 = jax.random.normal(keys[3], (b2, s2, nx2), dtype=jnp.float32)
    w2 = jax.random.normal(keys[4], (nx2, nf2), dtype=jnp.float32) * 0.02
    bi2 = jax.random.normal(keys[5], (nf2,), dtype=jnp.float32) * 0.02
    layer2 = FrozenConv1D(w2, bi2)
    out2 = jax.block_until_ready(layer2(x2))
    assert out2.shape == (b2, s2, nf2)
    assert jnp.allclose(out2, ref_forward(x2, w2, bi2), atol=2e-2, rtol=2e-2)

    # --- Demo 3: GPT-2 c_proj-like shape (nx=3072, nf=768) -> multi-K path
    #             (tk=1536, n_k=2) with direct f32 output accumulation ---
    b3, s3, nx3, nf3 = 2, 64, 3072, 768
    x3 = jax.random.normal(keys[6], (b3, s3, nx3), dtype=jnp.float32)
    w3 = jax.random.normal(keys[7], (nx3, nf3), dtype=jnp.float32) * 0.02
    bi3 = jax.random.normal(keys[8], (nf3,), dtype=jnp.float32) * 0.02
    layer3 = FrozenConv1D(w3, bi3)
    out3 = jax.block_until_ready(layer3(x3))
    assert out3.shape == (b3, s3, nf3)
    assert jnp.allclose(out3, ref_forward(x3, w3, bi3), atol=5e-2, rtol=5e-2)

    print("KERNEL_OK")
</pallas_src>

<mosaic_0001>
module attributes {stable_mosaic.version = 11 : i64} {
  func.func @_conv1d_kernel_single_k(%arg0: i32, %arg1: i32, %arg2: memref<16x128xbf16, #tpu.memory_space<vmem>>, %arg3: memref<128x128xbf16, #tpu.memory_space<vmem>>, %arg4: memref<1x128xf32, #tpu.memory_space<vmem>>, %arg5: memref<16x128xf32, #tpu.memory_space<vmem>>) attributes {dimension_semantics = [#tpu.dimension_semantics<parallel>, #tpu.dimension_semantics<parallel>], iteration_bounds = array<i64: 1, 1>, scalar_prefetch = 0 : i64, scratch_operands = 0 : i64, tpu.core_type = #tpu.core_type<tc>, window_params = [{transform_indices = @transform_0, window_bounds = array<i64: 16, 128>}, {transform_indices = @transform_1, window_bounds = array<i64: 128, 128>}, {transform_indices = @transform_2, window_bounds = array<i64: 1, 128>}, {transform_indices = @transform_3, window_bounds = array<i64: 16, 128>}]} {
    %c0 = arith.constant 0 : index
    %c0_0 = arith.constant 0 : index
    %0 = vector.load %arg2[%c0, %c0_0] : memref<16x128xbf16, #tpu.memory_space<vmem>>, vector<16x128xbf16>
    %c0_1 = arith.constant 0 : index
    %c0_2 = arith.constant 0 : index
    %1 = vector.load %arg3[%c0_1, %c0_2] : memref<128x128xbf16, #tpu.memory_space<vmem>>, vector<128x128xbf16>
    %cst = arith.constant dense<0.000000e+00> : vector<16x128xf32>
    %2 = tpu.matmul %0, %1, %cst {dimension_numbers = #tpu.dot_dimension_numbers<[1], [0], [0], [1], [0, 0, 1, 1], [], []>} : vector<16x128xbf16>, vector<128x128xbf16>, vector<16x128xf32> -> vector<16x128xf32>
    %c0_3 = arith.constant 0 : index
    %c0_4 = arith.constant 0 : index
    %3 = vector.load %arg4[%c0_3, %c0_4] : memref<1x128xf32, #tpu.memory_space<vmem>>, vector<1x128xf32>
    %4 = vector.broadcast %3 : vector<1x128xf32> to vector<16x128xf32>
    %5 = arith.addf %2, %4 : vector<16x128xf32>
    %c0_5 = arith.constant 0 : index
    %c0_6 = arith.constant 0 : index
    %6 = vector.load %arg5[%c0_5, %c0_6] : memref<16x128xf32, #tpu.memory_space<vmem>>, vector<16x128xf32>
    tpu.vector_store %arg5[%c0_5, %c0_6], %5 {strides = array<i32>} : memref<16x128xf32, #tpu.memory_space<vmem>>, vector<16x128xf32>,
    return
  }
  func.func @transform_0(%arg0: i32, %arg1: i32) -> (i32, i32) {
    %c0_i32 = arith.constant 0 : i32
    %c0_i32_0 = arith.constant 0 : i32
    return %arg0, %c0_i32 : i32, i32
  }
  func.func @transform_1(%arg0: i32, %arg1: i32) -> (i32, i32) {
    %c0_i32 = arith.constant 0 : i32
    %c0_i32_0 = arith.constant 0 : i32
    return %c0_i32, %arg1 : i32, i32
  }
  func.func @transform_2(%arg0: i32, %arg1: i32) -> (i32, i32) {
    %c0_i32 = arith.constant 0 : i32
    %c0_i32_0 = arith.constant 0 : i32
    return %c0_i32, %arg1 : i32, i32
  }
  func.func @transform_3(%arg0: i32, %arg1: i32) -> (i32, i32) {
    %c0_i32 = arith.constant 0 : i32
    return %arg0, %arg1 : i32, i32
  }
}

</mosaic_0001>

<bundles_post_ra>
// kernel: _frozen_conv1d_forward.1
= control target key start
LH: loop header
LB: loop body
LE: loop exit
PB: predicated region body
PF: predicated region fallthrough
CT: control target
= control target key end

     0   :  { %8 = vsyncpa [#allocation3], 0  ;;  %s233_s12 = smov [#allocation2]   ;;  %s282_s0 = inlined_call_operand.vmem [shape: bf16[16,128], index: 0, kind: input, shape index: {}]   ;;  %s283_s1 = inlined_call_operand.hbm [shape: bf16[128,128], index: 1, kind: input, shape index: {}]   ;;  %s284_s2 = inlined_call_operand.vmem [shape: f32[1,128], index: 2, kind: input, shape index: {}]   ;;  %s285_s3 = inlined_call_operand.vmem [shape: f32[16,128], index: 3, kind: output, shape index: {}]  }
   0x1   :  { %s16_s13 = sshll.u32 %s233_s12, 4  ;;  %s209_s16 = scalar_lea.hbm %s283_s1, 1024  ;;  %s17_s13 = int_to_ptr.vmem [resolvable:$true] %s16_s13 }
   0x2   :  { %p210_p0 = scmp.ne.s32.totalorder %s283_s1, %s209_s16  ;;  %p213_p1 = scmp.lt.u32.totalorder %s209_s16, %s283_s1 }
   0x4   :  { %p215_p2 = pnand %p213_p1, %p210_p0 }
   0x6   :  { %218 = shalt.err (!%p215_p2)
}
   0x7   :  { %s219_s21 = scalar_lea.vmem %s17_s13, 1024  ;;  %p224_p4 = scmp.lt.s32.totalorder %s17_s13, %s17_s13 }
   0x8   :  { %p220_p3 = scmp.ne.s32.totalorder %s17_s13, %s219_s21  ;;  %p225_p5 = scmp.lt.s32.totalorder %s219_s21, %s219_s21 }
   0xa   :  { %p226_p6 = por %p225_p5, %p224_p4 }
   0xc   :  { %p227_p7 = pnand %p226_p6, %p220_p3 }
   0xe   :  { %230 = shalt.err (!%p227_p7)
}
   0xf   :  { %s234_s22 = smov 64   ;;  %s235_s23 = smov 4  }
  0x10   :  { %22 = dma.hbm_to_vmem [thread:$0]  %s283_s1, 1024, %s17_s13, [#allocation3], %s234_s22, %s234_s22, %s235_s23  }
  0x11   :  { %231 = dma.done.wait [#allocation3], 1024  }
  0x12   :  { %232 = vsyncadd [#allocation3], 4294966272  ;;  %v236_v0 = vmov 0.0   ;;  %vm237_vm0 = vmmov 0   ;;  %v200_v1 = vld [vmem:[#allocation2] sm:$0xff]   ;;  %v201_v2 = vld [vmem:[#allocation2 + $0x8] sm:$0xff]  }
  0x13   :  { %175 = vmatprep.subr.bf16.mxu0 %v236_v0  ;;  %191 = vmatprep.mubr.msk.bf16.mxu0 %vm237_vm0, %v236_v0  ;;  %v202_v3 = vld [vmem:[#allocation2 + $0x10] sm:$0xff]   ;;  %v203_v4 = vld [vmem:[#allocation2 + $0x18] sm:$0xff]   ;;  %v204_v5 = vld [vmem:[#allocation2 + $0x20] sm:$0xff]  }
  0x14   :  { %176 = vmatpush3.bf16.msra.mxu0 %v200_v1  ;;  %v205_v6 = vld [vmem:[#allocation2 + $0x28] sm:$0xff]   ;;  %v206_v7 = vld [vmem:[#allocation2 + $0x30] sm:$0xff]   ;;  %v207_v8 = vld [vmem:[#allocation2 + $0x38] sm:$0xff]  }
  0x15   :  { %177 = vmatprep.subr.bf16.mxu0 %v236_v0  ;;  %v208_v9 = vld [vmem:[%s282_s0] sm:$0xff]  }
  0x16   :  { %v156_v10 = vld [vmem:[%s284_s2] ss:$0 sm:$0xff] }
  0x18   :  { %178 = vmatpush3.bf16.msra.mxu0 %v201_v2 }
  0x19   :  { %179 = vmatprep.subr.bf16.mxu0 %v236_v0 }
  0x1c   :  { %180 = vmatpush3.bf16.msra.mxu0 %v202_v3 }
  0x1d   :  { %181 = vmatprep.subr.bf16.mxu0 %v236_v0 }
  0x20   :  { %182 = vmatpush3.bf16.msra.mxu0 %v203_v4 }
  0x21   :  { %183 = vmatprep.subr.bf16.mxu0 %v236_v0 }
  0x24   :  { %184 = vmatpush3.bf16.msra.mxu0 %v204_v5 }
  0x25   :  { %185 = vmatprep.subr.bf16.mxu0 %v236_v0 }
  0x28   :  { %186 = vmatpush3.bf16.msra.mxu0 %v205_v6 }
  0x29   :  { %187 = vmatprep.subr.bf16.mxu0 %v236_v0 }
  0x2c   :  { %188 = vmatpush3.bf16.msra.mxu0 %v206_v7 }
  0x2d   :  { %189 = vmatprep.subr.bf16.mxu0 %v236_v0 }
  0x30   :  { %190 = vmatpush3.bf16.msra.mxu0 %v207_v8 }
  0x33   :  { %192 = vmatmul.mubr.bf16.vlgmr.msra.gmra.mrb[0].mxu0 %v208_v9 }
 0x106   :  { %v142_v11 = vpop.f32.mrb[0].mxu0 }
 0x107   :  { %v143_v12 = vadd.f32 %v156_v10, %v142_v11  ;;  %v193_v13 = vpop.f32.mrb[1].mxu0 }
 0x108   :  { %v145_v14 = vpop.f32.mrb[2].mxu0 }
 0x109   :  { %149 = vst [vmem:[%s285_s3] sm:$0xff] %v143_v12  ;;  %v146_v15 = vadd.f32 %v156_v10, %v145_v14  ;;  %v194_v16 = vpop.f32.mrb[3].mxu0 }
 0x10b   :  { %150 = vst [vmem:[%s285_s3 + $0x8] sm:$0xff] %v146_v15 }
 0x10c   :  { %155 = vsyncpa [#allocation3], 1 }

</bundles_post_ra>
